<compile_context>
chip_gen: v7x
topology: tpu7x:2x2x1
jax: 0.10.0
libtpu: 0.0.40
codegen_flags: <defaults>
</compile_context>

<pallas_src>
import functools

import jax
import jax.numpy as jnp
from jax.experimental import pallas as pl
from jax.experimental.pallas import tpu as pltpu

_LANE = 128


def _round_up(n, m):
    return ((n + m - 1) // m) * m


# ----------------------------- Pallas kernel ------------------------------- #

def _fused_mlp_kernel(*refs, n_layers):
    """Fused MLP forward.

    refs = (x_ref, w0_ref, b0_ref, ..., w_{L-1}_ref, b_{L-1}_ref, o_ref)

    Hidden layers:  h = relu(h @ W_l + b_l)
    Final layer:    o = h @ W_L + b_L        (b_L already includes extra bias,
                                              columns zero-padded to lane width)
    Matmuls run in bf16 on the MXU with f32 accumulation; bias/ReLU in f32.
    """
    x_ref = refs[0]
    o_ref = refs[-1]
    h = x_ref[...]                                   # f32 activations
    for l in range(n_layers):                        # static unroll
        w_ref = refs[1 + 2 * l]
        b_ref = refs[2 + 2 * l]
        y = jnp.dot(h.astype(w_ref.dtype), w_ref[...],
                    preferred_element_type=jnp.float32)
        y = y + b_ref[...]                           # (1, N) broadcast, f32
        if l < n_layers - 1:
            h = jnp.maximum(y, 0.0)                  # ReLU
        else:
            o_ref[...] = y.astype(o_ref.dtype)       # lane-dense final store


# --------------------------- Parameter handling ----------------------------- #

def init_lmpl_params(key, input_dim, output_dim, hidden_layers):
    """Deterministic parameter init mirroring LMPL_org.__init__ (f32, (in,out))."""
    dims = [input_dim] + list(hidden_layers) + [output_dim] if hidden_layers \
        else [input_dim, output_dim]
    params = {"weights": [], "biases": []}
    for i in range(len(dims) - 1):
        fan_in, fan_out = dims[i], dims[i + 1]
        key, kw, kb = jax.random.split(key, 3)
        # kaiming_normal_(fan_in, relu): std = sqrt(2 / fan_in)
        w = jax.random.normal(kw, (fan_in, fan_out), jnp.float32) * jnp.sqrt(2.0 / fan_in)
        # nn.Linear default bias init: U(-1/sqrt(fan_in), 1/sqrt(fan_in))
        bound = 1.0 / jnp.sqrt(float(fan_in))
        b = jax.random.uniform(kb, (fan_out,), jnp.float32, -bound, bound)
        params["weights"].append(w)
        params["biases"].append(b)
    key, kbias = jax.random.split(key)
    params["extra_bias"] = jax.random.normal(kbias, (output_dim,), jnp.float32)
    return params


def prepare_fused_params(params, matmul_dtype=jnp.bfloat16, lane_pad=_LANE):
    """One-time prep outside the hot path: fold biases, pad output lanes, cast."""
    ws, bs = params["weights"], params["biases"]
    out_dim = ws[-1].shape[1]
    padded_out = _round_up(out_dim, lane_pad)

    layers = []
    n = len(ws)
    for i, (w, b) in enumerate(zip(ws, bs)):
        if i == n - 1:
            # fold module-level extra bias into the last layer bias, zero-pad
            # columns so the final store is lane-dense.
            b = b + params["extra_bias"]
            w = jnp.pad(w, ((0, 0), (0, padded_out - out_dim)))
            b = jnp.pad(b, (0, padded_out - out_dim))
        w = w.astype(matmul_dtype)
        b = b.reshape(1, -1).astype(jnp.float32)
        layers.append((w, b))
    return {"layers": layers, "out_dim": out_dim, "padded_out_dim": padded_out}


# ------------------------------ Forward pass -------------------------------- #

def lmpl_forward(fused, x, tile_m=256):
    """Forward identical to LMPL_org.forward; whole MLP in one pallas_call."""
    layers = fused["layers"]
    n_layers = len(layers)
    out_dim = fused["out_dim"]
    n_pad = fused["padded_out_dim"]
    M, D0 = x.shape

    kernel = functools.partial(_fused_mlp_kernel, n_layers=n_layers)

    args = [x]
    for w, b in layers:
        args += [w, b]

    if M <= tile_m:
        # Single block, no grid: everything (params ~ tens of KB) sits in VMEM.
        in_specs = [pl.BlockSpec((M, D0), lambda: (0, 0))]
        for w, b in layers:
            in_specs.append(pl.BlockSpec(w.shape, lambda: (0, 0)))
            in_specs.append(pl.BlockSpec(b.shape, lambda: (0, 0)))
        out = pl.pallas_call(
            kernel,
            out_shape=jax.ShapeDtypeStruct((M, n_pad), jnp.float32),
            in_specs=in_specs,
            out_specs=pl.BlockSpec((M, n_pad), lambda: (0, 0)),
        )(*args)
        return out[:, :out_dim]

    # Batch-tiled grid path: weights VMEM-resident (constant index_map),
    # activation tiles auto-pipelined, batch axis sharded across cores (v7x).
    Mp = _round_up(M, tile_m)
    xp = jnp.pad(x, ((0, Mp - M), (0, 0)))
    args[0] = xp

    in_specs = [pl.BlockSpec((tile_m, D0), lambda i: (i, 0))]
    for w, b in layers:
        in_specs.append(pl.BlockSpec(w.shape, lambda i: (0, 0)))
        in_specs.append(pl.BlockSpec(b.shape, lambda i: (0, 0)))
    out = pl.pallas_call(
        kernel,
        out_shape=jax.ShapeDtypeStruct((Mp, n_pad), jnp.float32),
        grid=(Mp // tile_m,),
        in_specs=in_specs,
        out_specs=pl.BlockSpec((tile_m, n_pad), lambda i: (i, 0)),
        compiler_params=pltpu.CompilerParams(dimension_semantics=("parallel",)),
    )(*args)
    return out[:M, :out_dim]


# --------------------------------- main ------------------------------------ #

if __name__ == "__main__":
    input_dim = 32
    hidden_layers = [64, 48]
    output_dim = 16
    batch = 8

    key = jax.random.PRNGKey(0)
    key, kx = jax.random.split(key)
    x = jax.random.normal(kx, (batch, input_dim), jnp.float32)

    params = init_lmpl_params(key, input_dim, output_dim, hidden_layers)
    fused = prepare_fused_params(params)

    # Pure-JAX f32 reference (matches LMPL_org.forward).
    def ref_forward(p, xin):
        h = xin
        for w, b in zip(p["weights"][:-1], p["biases"][:-1]):
            h = jnp.maximum(h @ w + b, 0.0)
        return h @ p["weights"][-1] + p["biases"][-1] + p["extra_bias"]

    # 1) single-block path (batch=8)
    y = lmpl_forward(fused, x)
    jax.block_until_ready(y)
    y_ref = ref_forward(params, x)
    assert y.shape == (batch, output_dim)
    # bf16 matmul operands (f32 accumulation) -> loosened tolerance vs f32 ref.
    assert jnp.allclose(y, y_ref, atol=5e-2, rtol=5e-2)

    # 2) batch-tiled grid path (small shapes, exercises padding + pipelining)
    key, kx2 = jax.random.split(key)
    x2 = jax.random.normal(kx2, (20, input_dim), jnp.float32)
    y2 = lmpl_forward(fused, x2, tile_m=8)
    jax.block_until_ready(y2)
    y2_ref = ref_forward(params, x2)
    assert y2.shape == (20, output_dim)
    assert jnp.allclose(y2, y2_ref, atol=5e-2, rtol=5e-2)

    print("KERNEL_OK")
</pallas_src>

<mosaic_0001>
module attributes {stable_mosaic.version = 11 : i64} {
  func.func @_fused_mlp_kernel(%arg0: memref<8x32xf32, #tpu.memory_space<vmem>>, %arg1: memref<32x64xbf16, #tpu.memory_space<vmem>>, %arg2: memref<1x64xf32, #tpu.memory_space<vmem>>, %arg3: memref<64x48xbf16, #tpu.memory_space<vmem>>, %arg4: memref<1x48xf32, #tpu.memory_space<vmem>>, %arg5: memref<48x128xbf16, #tpu.memory_space<vmem>>, %arg6: memref<1x128xf32, #tpu.memory_space<vmem>>, %arg7: memref<8x128xf32, #tpu.memory_space<vmem>>) attributes {dimension_semantics = [], scalar_prefetch = 0 : i64, scratch_operands = 0 : i64, tpu.core_type = #tpu.core_type<tc>} {
    %c0 = arith.constant 0 : index
    %c0_0 = arith.constant 0 : index
    %0 = vector.load %arg0[%c0, %c0_0] : memref<8x32xf32, #tpu.memory_space<vmem>>, vector<8x32xf32>
    %1 = arith.truncf %0 : vector<8x32xf32> to vector<8x32xbf16>
    %c0_1 = arith.constant 0 : index
    %c0_2 = arith.constant 0 : index
    %2 = vector.load %arg1[%c0_1, %c0_2] : memref<32x64xbf16, #tpu.memory_space<vmem>>, vector<32x64xbf16>
    %cst = arith.constant dense<0.000000e+00> : vector<8x64xf32>
    %3 = tpu.matmul %1, %2, %cst {dimension_numbers = #tpu.dot_dimension_numbers<[1], [0], [0], [1], [0, 0, 1, 1], [], []>} : vector<8x32xbf16>, vector<32x64xbf16>, vector<8x64xf32> -> vector<8x64xf32>
    %c0_3 = arith.constant 0 : index
    %c0_4 = arith.constant 0 : index
    %4 = vector.load %arg2[%c0_3, %c0_4] : memref<1x64xf32, #tpu.memory_space<vmem>>, vector<1x64xf32>
    %5 = vector.broadcast %4 : vector<1x64xf32> to vector<8x64xf32>
    %6 = arith.addf %3, %5 : vector<8x64xf32>
    %cst_5 = arith.constant 0.000000e+00 : f32
    %7 = vector.broadcast %cst_5 : f32 to vector<8x64xf32>
    %8 = arith.maximumf %6, %7 : vector<8x64xf32>
    %9 = arith.truncf %8 : vector<8x64xf32> to vector<8x64xbf16>
    %c0_6 = arith.constant 0 : index
    %c0_7 = arith.constant 0 : index
    %10 = vector.load %arg3[%c0_6, %c0_7] : memref<64x48xbf16, #tpu.memory_space<vmem>>, vector<64x48xbf16>
    %cst_8 = arith.constant dense<0.000000e+00> : vector<8x48xf32>
    %11 = tpu.matmul %9, %10, %cst_8 {dimension_numbers = #tpu.dot_dimension_numbers<[1], [0], [0], [1], [0, 0, 1, 1], [], []>} : vector<8x64xbf16>, vector<64x48xbf16>, vector<8x48xf32> -> vector<8x48xf32>
    %c0_9 = arith.constant 0 : index
    %c0_10 = arith.constant 0 : index
    %12 = vector.load %arg4[%c0_9, %c0_10] : memref<1x48xf32, #tpu.memory_space<vmem>>, vector<1x48xf32>
    %13 = vector.broadcast %12 : vector<1x48xf32> to vector<8x48xf32>
    %14 = arith.addf %11, %13 : vector<8x48xf32>
    %cst_11 = arith.constant 0.000000e+00 : f32
    %15 = vector.broadcast %cst_11 : f32 to vector<8x48xf32>
    %16 = arith.maximumf %14, %15 : vector<8x48xf32>
    %17 = arith.truncf %16 : vector<8x48xf32> to vector<8x48xbf16>
    %c0_12 = arith.constant 0 : index
    %c0_13 = arith.constant 0 : index
    %18 = vector.load %arg5[%c0_12, %c0_13] : memref<48x128xbf16, #tpu.memory_space<vmem>>, vector<48x128xbf16>
    %cst_14 = arith.constant dense<0.000000e+00> : vector<8x128xf32>
    %19 = tpu.matmul %17, %18, %cst_14 {dimension_numbers = #tpu.dot_dimension_numbers<[1], [0], [0], [1], [0, 0, 1, 1], [], []>} : vector<8x48xbf16>, vector<48x128xbf16>, vector<8x128xf32> -> vector<8x128xf32>
    %c0_15 = arith.constant 0 : index
    %c0_16 = arith.constant 0 : index
    %20 = vector.load %arg6[%c0_15, %c0_16] : memref<1x128xf32, #tpu.memory_space<vmem>>, vector<1x128xf32>
    %21 = vector.broadcast %20 : vector<1x128xf32> to vector<8x128xf32>
    %22 = arith.addf %19, %21 : vector<8x128xf32>
    %c0_17 = arith.constant 0 : index
    %c0_18 = arith.constant 0 : index
    %23 = vector.load %arg7[%c0_17, %c0_18] : memref<8x128xf32, #tpu.memory_space<vmem>>, vector<8x128xf32>
    tpu.vector_store %arg7[%c0_17, %c0_18], %22 {strides = array<i32>} : memref<8x128xf32, #tpu.memory_space<vmem>>, vector<8x128xf32>,
    return
  }
}

</mosaic_0001>

<bundles_post_ra>
// kernel: tpu_custom_call.1
= control target key start
LH: loop header
LB: loop body
LE: loop exit
PB: predicated region body
PF: predicated region fallthrough
CT: control target
= control target key end

     0   :  { %v367_v1 = vmov 0.0   ;;  %vm368_vm0 = vmmov 0   ;;  %vm53_vm1 = vcmask 261120   ;;  %s464_s0 = inlined_call_operand.vmem [shape: f32[8,32], index: 0, kind: input, shape index: {}]   ;;  %s465_s1 = inlined_call_operand.vmem [shape: bf16[32,64], index: 1, kind: input, shape index: {}]   ;;  %s466_s2 = inlined_call_operand.vmem [shape: f32[1,64], index: 2, kind: input, shape index: {}]   ;;  %s467_s3 = inlined_call_operand.vmem [shape: bf16[64,48], index: 3, kind: input, shape index: {}]   ;;  %s468_s4 = inlined_call_operand.vmem [shape: f32[1,48], index: 4, kind: input, shape index: {}]   ;;  %s469_s5 = inlined_call_operand.vmem [shape: bf16[48,128], index: 5, kind: input, shape index: {}]   ;;  %s470_s6 = inlined_call_operand.vmem [shape: f32[1,128], index: 6, kind: input, shape index: {}]   ;;  %s471_s7 = inlined_call_operand.hbm [shape: f32[8,128], index: 7, kind: output, shape index: {}]  }
   0x1   :  { %v334_v0 = vld [vmem:[%s465_s1] sm:$0xff]   ;;  %301 = vmatprep.subr.bf16.mxu0 %v367_v1  ;;  %v335_v2 = vld [vmem:[%s465_s1 + $0x8] sm:$0xff]   ;;  %309 = vmatprep.subr.bf16.mxu1 %v367_v1 }
   0x2   :  { %302 = vmatpush3.bf16.msra.mxu0 %v334_v0  ;;  %305 = vmatprep.mubr.msk.bf16.mxu0 %vm368_vm0, %v367_v1  ;;  %v28_v3 = vld [vmem:[%s464_s0] sm:$0xff]  ;;  %v337_v5 = vld [vmem:[%s467_s3 + $0x8] sm:$0xff]  }
   0x3   :  { %303 = vmatprep.subr.bf16.mxu0 %v367_v1  ;;  %v336_v4 = vld [vmem:[%s467_s3] sm:$0xff]   ;;  %317 = vmatprep.mubr.msk.bf16.mxu1 %vm368_vm0, %v367_v1  ;;  %v29_v6 = vpack.c.bf16 %v28_v3, %v28_v3 }
   0x4   :  { %310 = vmatpush3.bf16.msra.mxu1 %v336_v4 }
   0x5   :  { %311 = vmatprep.subr.bf16.mxu1 %v367_v1 }
   0x6   :  { %304 = vmatpush3.bf16.msra.mxu0 %v335_v2 }
   0x7   :  { %321 = vmatprep.subr.bf16.mxu0 %v367_v1 }
   0x8   :  { %12 = vsyncpa [#allocation3], 0  ;;  %312 = vmatpush3.bf16.msra.mxu1 %v337_v5  ;;  %v338_v7 = vld [vmem:[%s467_s3 + $0x10] sm:$0xff]   ;;  %v339_v8 = vld [vmem:[%s467_s3 + $0x18] sm:$0xff]   ;;  %vm138_vm2 = vcmask 523264   ;;  %vm215_vm3 = vcmask 392192  }
   0x9   :  { %306 = vmatmul.mubr.msk.bf16.vlgmr.msra.gmra.mrb[0].mxu0 %vm53_vm1, %v29_v6  ;;  %313 = vmatprep.subr.bf16.mxu1 %v367_v1  ;;  %v340_v9 = vld [vmem:[%s469_s5] sm:$0xff]   ;;  %v341_v18 = vld [vmem:[%s469_s5 + $0x8] sm:$0xff]   ;;  %v342_v19 = vld [vmem:[%s469_s5 + $0x10] sm:$0xff]   ;;  %s369_s23 = smov [#allocation2]  }
   0xa   :  { %327 = vmatprep.mubr.msk.bf16.mxu0 %vm368_vm0, %v367_v1  ;;  %322 = vmatpush3.bf16.msra.mxu0 %v340_v9  ;;  %v274_v10 = vld [vmem:[%s466_s2] ss:$0 sm:$0xff]  ;;  %s266_s5 = sshll.u32 %s369_s23, 4  ;;  %s267_s5 = int_to_ptr.vmem [resolvable:$true] %s266_s5 }
   0xb   :  { %323 = vmatprep.subr.bf16.mxu0 %v367_v1  ;;  %v278_v20 = vld [vmem:[%s468_s4] ss:$0 sm:$0xff]  ;;  %s343_s4 = scalar_lea.vmem %s267_s5, 128  ;;  %p348_p1 = scmp.lt.s32.totalorder %s267_s5, %s267_s5 }
   0xc   :  { %314 = vmatpush3.bf16.msra.mxu1 %v338_v7  ;;  %v284_v28 = vld [vmem:[%s470_s6] ss:$0 sm:$0xff]  ;;  %p344_p0 = scmp.ne.s32.totalorder %s267_s5, %s343_s4  ;;  %p349_p2 = scmp.lt.s32.totalorder %s343_s4, %s343_s4 }
   0xd   :  { %315 = vmatprep.subr.bf16.mxu1 %v367_v1 }
   0xe   :  { %324 = vmatpush3.bf16.msra.mxu0 %v341_v18  ;;  %p350_p3 = por %p349_p2, %p348_p1 }
   0xf   :  { %325 = vmatprep.subr.bf16.mxu0 %v367_v1 }
  0x10   :  { %316 = vmatpush3.bf16.msra.mxu1 %v339_v8  ;;  %p351_p4 = pnand %p350_p3, %p344_p0 }
  0x12   :  { %326 = vmatpush3.bf16.msra.mxu0 %v342_v19 }
  0xdc   :  { %v91_v11 = vpop.f32.mrb[0].mxu0 }
  0xdd   :  { %v92_v12 = vadd.f32 %v274_v10, %v91_v11  ;;  %v307_v13 = vpop.f32.mrb[1].mxu0 }
  0xde   :  { %v94_v14 = vpop.f32.mrb[2].mxu0 }
  0xdf   :  { %v97_v15 = vmax.f32 %v92_v12, 0.0  ;;  %v308_v16 = vpop.f32.mrb[3].mxu0 }
  0xe1   :  { %v98_v17 = vpack.c.bf16 %v97_v15, %v97_v15 }
  0xe3   :  { %318 = vmatmul.mubr.msk.bf16.vlgmr.msra.gmra.mrb[0].mxu1 %vm138_vm2, %v98_v17 }
 0x1b6   :  { %v176_v21 = vpop.f32.mrb[0].mxu1 }
 0x1b7   :  { %v177_v22 = vadd.f32 %v278_v20, %v176_v21  ;;  %v319_v23 = vpop.f32.mrb[1].mxu1 }
 0x1b8   :  { %v179_v24 = vpop.f32.mrb[2].mxu1 }
 0x1b9   :  { %v182_v25 = vmax.f32 %v177_v22, 0.0  ;;  %v320_v26 = vpop.f32.mrb[3].mxu1 }
 0x1bb   :  { %v183_v27 = vpack.c.bf16 %v182_v25, %v182_v25 }
 0x1bd   :  { %328 = vmatmul.mubr.msk.bf16.vlgmr.msra.gmra.mrb[4].mxu0 %vm215_vm3, %v183_v27 }
 0x290   :  { %v253_v29 = vpop.f32.mrb[4].mxu0 }
 0x291   :  { %v254_v30 = vadd.f32 %v284_v28, %v253_v29  ;;  %v329_v31 = vpop.f32.mrb[5].mxu0 }
 0x292   :  { %v256_v32 = vpop.f32.mrb[6].mxu0 }
 0x293   :  { %259 = vst [vmem:[#allocation2] sm:$0xff] %v254_v30  ;;  %v330_v33 = vpop.f32.mrb[7].mxu0 }
 0x294   :  { %354 = shalt.err (!%p351_p4)
}
 0x295   :  { %s355_s6 = scalar_lea.hbm %s471_s7, 128 }
 0x296   :  { %p356_p5 = scmp.ne.s32.totalorder %s471_s7, %s355_s6  ;;  %p359_p6 = scmp.lt.u32.totalorder %s355_s6, %s471_s7 }
 0x298   :  { %p361_p7 = pnand %p359_p6, %p356_p5 }
 0x29a   :  { %364 = shalt.err (!%p361_p7)
}
 0x29b   :  { %269 = dma.vmem_to_hbm [thread:$0]  %s267_s5, 128, %s471_s7, [#allocation3]  }
 0x29c   :  { %365 = dma.done.wait [#allocation3], 128  }
 0x29d   :  { %366 = vsyncadd [#allocation3], 4294967168 }
 0x29e   :  { %273 = vsyncpa [#allocation3], 1 }

</bundles_post_ra>
